<compile_context>
chip_gen: v7x
topology: tpu7x:2x2x1
jax: 0.10.0
libtpu: 0.0.40
codegen_flags: <defaults>
</compile_context>

<pallas_src>
import functools
from typing import NamedTuple, Optional

import jax
import jax.numpy as jnp
from jax.experimental import pallas as pl
from jax.experimental.pallas import tpu as pltpu


def _round_up(x: int, m: int) -> int:
    return ((x + m - 1) // m) * m


def _device_kind() -> str:
    try:
        return jax.devices()[0].device_kind.lower()
    except Exception:
        return ""


def _default_lane_align() -> int:
    # v6e/v7x MXU is 2x256x256 -> 256-aligned contraction/output dims fill each
    # systolic pass; v5e's 4x128x128 MXU is already saturated at 128.
    return 128 if "v5" in _device_kind() else 256


def _default_tile_n() -> int:
    # v7x: 64 MiB VMEM / 2 TensorCores -> smaller row tiles.
    # v5e/v6e: 128 MiB VMEM -> 1024-row tiles amortize per-step overhead.
    return 512 if "7" in _device_kind() else 1024


def _vmem_limit_bytes() -> int:
    mib = 1024 * 1024
    cap = None
    try:
        cap = pltpu.get_tpu_info().vmem_capacity_bytes
    except Exception:
        cap = None
    if not cap:
        cap = 64 * mib if "7" in _device_kind() else 128 * mib
    # ~102 MiB on 128-MiB parts (v5e/v6e), ~51 MiB on 64-MiB parts (v7x).
    return min(int(cap * 0.8), int(cap) - 12 * mib)


class TwoLayerNetParams(NamedTuple):
    w1: jax.Array   # (d_in_p, h_p)    mxu dtype (bf16 or f32), zero padded
    b1: jax.Array   # (1, h_p)         f32, zero padded
    w2: jax.Array   # (h_p, d_out_p)   mxu dtype, zero padded
    b2: jax.Array   # (1, d_out_p)     f32, zero padded
    d_out: int      # logical D_out
    tile_h: int     # H-tile size (divides h_p)


def prepare_params(w1, b1, w2, b2, *, use_bf16: bool = True,
                   lane_align: Optional[int] = None,
                   tile_h: int = 512) -> TwoLayerNetParams:
    """Pad + cast the Linear parameters ONCE (hoisted out of the per-call path).

    w1: (D_in, H) transposed torch weight, b1: (1, H) or (H,)
    w2: (H, D_out) transposed torch weight, b2: (1, D_out) or (D_out,)
    Zero padding is exact: padded D_in cols hit zero W1 rows, padded H cols are
    relu(0+0)=0 and hit zero W2 rows, padded D_out cols are dropped later.
    """
    if lane_align is None:
        lane_align = _default_lane_align()
    D_in, H = w1.shape
    D_out = w2.shape[1]
    mxu_dtype = jnp.bfloat16 if use_bf16 else jnp.float32

    d_in_p = _round_up(D_in, lane_align)
    tile_h = min(_round_up(tile_h, lane_align), _round_up(H, lane_align))
    h_p = _round_up(H, tile_h)               # h_p is a multiple of tile_h
    d_out_p = _round_up(D_out, lane_align)

    b1 = jnp.asarray(b1, jnp.float32).reshape(1, H)
    b2 = jnp.asarray(b2, jnp.float32).reshape(1, D_out)

    w1_p = jnp.zeros((d_in_p, h_p), mxu_dtype).at[:D_in, :H].set(
        w1.astype(mxu_dtype))
    b1_p = jnp.zeros((1, h_p), jnp.float32).at[:, :H].set(b1)
    w2_p = jnp.zeros((h_p, d_out_p), mxu_dtype).at[:H, :D_out].set(
        w2.astype(mxu_dtype))
    b2_p = jnp.zeros((1, d_out_p), jnp.float32).at[:, :D_out].set(b2)

    return TwoLayerNetParams(w1_p, b1_p, w2_p, b2_p, d_out=D_out, tile_h=tile_h)


def two_layer_net_kernel(x_ref, w1_ref, b1_ref, w2_ref, b2_ref, o_ref, acc_ref):
    k = pl.program_id(1)

    @pl.when(k == 0)
    def _():
        acc_ref[...] = jnp.zeros_like(acc_ref)

    # h_tile = relu(x @ W1[:, kH] + b1[kH])  (f32 MXU accumulate, f32 epilogue)
    h = jnp.dot(x_ref[...], w1_ref[...], preferred_element_type=jnp.float32)
    h = jnp.maximum(h + b1_ref[...], 0.0)

    # Partial second matmul over this H tile, accumulated in f32 VMEM scratch.
    acc_ref[...] += jnp.dot(h.astype(w2_ref.dtype), w2_ref[...],
                            preferred_element_type=jnp.float32)

    @pl.when(k == pl.num_programs(1) - 1)
    def _():
        o_ref[...] = (acc_ref[...] + b2_ref[...]).astype(o_ref.dtype)


@functools.partial(jax.jit, static_argnames=("d_out", "tile_h", "tile_n"))
def _two_layer_net_impl(x, w1_p, b1_p, w2_p, b2_p, *, d_out, tile_h, tile_n=None):
    N, D_in = x.shape
    d_in_p, h_p = w1_p.shape
    d_out_p = w2_p.shape[1]
    mxu_dtype = w1_p.dtype
    assert D_in <= d_in_p and h_p % tile_h == 0

    if tile_n is None:
        tile_n = _default_tile_n()
    # Keep >= ~8 row tiles so the "parallel" axis feeds both v7x TensorCores
    # and the pipeline can overlap DMA with compute; tile_n stays a multiple
    # of 8 (sublane) and never exceeds the requested tile.
    tile_n = max(8, min(tile_n, _round_up(pl.cdiv(N, 8), 8)))
    n_p = _round_up(N, tile_n)

    # Stream x straight from HBM when it is already row/lane aligned and only
    # pad (an extra HBM round trip) when strictly necessary.
    if (n_p, d_in_p) == (N, D_in):
        x_in = x.astype(mxu_dtype)
    else:
        x_in = jnp.zeros((n_p, d_in_p), mxu_dtype).at[:N, :D_in].set(
            x.astype(mxu_dtype))

    grid = (n_p // tile_n, h_p // tile_h)

    # TODO(synk): once pipeline_mode=pl.Buffered(1) is stable for the TPU
    # pallas_call pipeline, single-buffer the constant-index b2 spec (and the
    # weight specs when grid[1] == 1) to shave the duplicate VMEM copy.
    y_p = pl.pallas_call(
        two_layer_net_kernel,
        out_shape=jax.ShapeDtypeStruct((n_p, d_out_p), jnp.float32),
        grid=grid,
        in_specs=[
            # x row-tile: resident across the H axis, streamed across rows.
            pl.BlockSpec((tile_n, d_in_p), lambda i, k: (i, 0)),
            # W1 / b1: streamed over H tiles.
            pl.BlockSpec((d_in_p, tile_h), lambda i, k: (0, k)),
            pl.BlockSpec((1, tile_h), lambda i, k: (0, k)),
            # W2: streamed over H tiles (contraction dim).
            pl.BlockSpec((tile_h, d_out_p), lambda i, k: (k, 0)),
            # b2: constant block, VMEM resident.
            pl.BlockSpec((1, d_out_p), lambda i, k: (0, 0)),
        ],
        out_specs=pl.BlockSpec((tile_n, d_out_p), lambda i, k: (i, 0)),
        scratch_shapes=[pltpu.VMEM((tile_n, d_out_p), jnp.float32)],
        compiler_params=pltpu.CompilerParams(
            dimension_semantics=("parallel", "arbitrary"),
            vmem_limit_bytes=_vmem_limit_bytes(),
        ),
    )(x_in, w1_p, b1_p, w2_p, b2_p)

    # Skip the post-kernel slice (a full extra HBM round trip) when the padded
    # output already equals the logical output.
    if (n_p, d_out_p) == (N, d_out):
        return y_p
    return y_p[:N, :d_out]


def two_layer_net(x, params: TwoLayerNetParams, *, tile_n: Optional[int] = None):
    """Forward pass: relu(x @ W1 + b1) @ W2 + b2 -> (N, D_out) float32."""
    return _two_layer_net_impl(
        x, params.w1, params.b1, params.w2, params.b2,
        d_out=params.d_out, tile_h=params.tile_h, tile_n=tile_n)


def init_linear_params(key, fan_in, fan_out):
    """Deterministic init matching torch.nn.Linear's U(-1/sqrt(fan_in), ...)."""
    k_w, k_b = jax.random.split(key)
    bound = 1.0 / jnp.sqrt(jnp.float32(fan_in))
    # Stored already transposed: (fan_in, fan_out)
    w = jax.random.uniform(k_w, (fan_in, fan_out), jnp.float32, -bound, bound)
    b = jax.random.uniform(k_b, (1, fan_out), jnp.float32, -bound, bound)
    return w, b


if __name__ == "__main__":
    # Small shapes consistent with the module: x = randn(N, D_in).
    # NOTE: at these toy sizes the kernel is launch/DMA-latency bound; the
    # bf16/H-tiling/VMEM-limit choices above matter at production sizes.
    N, D_in, H, D_out = 8, 32, 64, 16

    key = jax.random.PRNGKey(0)
    k_x, k_l1, k_l2 = jax.random.split(key, 3)

    x = jax.random.normal(k_x, (N, D_in), jnp.float32)
    w1, b1 = init_linear_params(k_l1, D_in, H)
    w2, b2 = init_linear_params(k_l2, H, D_out)

    # Pure-JAX reference of the same forward pass.
    y_ref = jnp.maximum(x @ w1 + b1, 0.0) @ w2 + b2

    # f32 MXU path: tight-tolerance correctness check.
    params_f32 = prepare_params(w1, b1, w2, b2, use_bf16=False)
    y_f32 = jax.block_until_ready(two_layer_net(x, params_f32))
    assert y_f32.shape == (N, D_out)
    assert jnp.allclose(y_f32, y_ref, atol=1e-4, rtol=1e-4)

    # Production path: bf16 MXU inputs, f32 accumulate + f32 epilogue
    # (loosened tolerance due to bf16 rounding of inputs and the h re-cast).
    params_bf16 = prepare_params(w1, b1, w2, b2, use_bf16=True)
    y_bf16 = jax.block_until_ready(two_layer_net(x, params_bf16))
    assert y_bf16.shape == (N, D_out)
    assert jnp.allclose(y_bf16, y_ref, atol=5e-2, rtol=5e-2)

    print("KERNEL_OK")
</pallas_src>

<mosaic_0001>
module attributes {stable_mosaic.version = 11 : i64} {
  func.func @two_layer_net_kernel(%arg0: i32, %arg1: i32, %arg2: memref<8x256xf32, #tpu.memory_space<vmem>>, %arg3: memref<256x256xf32, #tpu.memory_space<vmem>>, %arg4: memref<1x256xf32, #tpu.memory_space<vmem>>, %arg5: memref<256x256xf32, #tpu.memory_space<vmem>>, %arg6: memref<1x256xf32, #tpu.memory_space<vmem>>, %arg7: memref<8x256xf32, #tpu.memory_space<vmem>>, %arg8: memref<8x256xf32, #tpu.memory_space<vmem>>) attributes {dimension_semantics = [#tpu.dimension_semantics<parallel>, #tpu.dimension_semantics<arbitrary>], iteration_bounds = array<i64: 1, 1>, scalar_prefetch = 0 : i64, scratch_operands = 1 : i64, tpu.core_type = #tpu.core_type<tc>, window_params = [{transform_indices = @transform_0, window_bounds = array<i64: 8, 256>}, {transform_indices = @transform_1, window_bounds = array<i64: 256, 256>}, {transform_indices = @transform_2, window_bounds = array<i64: 1, 256>}, {transform_indices = @transform_3, window_bounds = array<i64: 256, 256>}, {pipeline_mode = #tpu.pipeline_mode<synchronous>, transform_indices = @transform_4, window_bounds = array<i64: 1, 256>}, {transform_indices = @transform_5, window_bounds = array<i64: 8, 256>}]} {
    %c0_i32 = arith.constant 0 : i32
    %0 = arith.cmpi eq, %arg1, %c0_i32 : i32
    %1 = arith.extui %0 : i1 to i32
    %c0_i32_0 = arith.constant 0 : i32
    %2 = arith.cmpi ne, %1, %c0_i32_0 : i32
    scf.if %2 {
      %cst_16 = arith.constant 0.000000e+00 : f32
      %19 = vector.broadcast %cst_16 : f32 to vector<8x256xf32>
      %c0_17 = arith.constant 0 : index
      %c0_18 = arith.constant 0 : index
      %20 = vector.load %arg8[%c0_17, %c0_18] : memref<8x256xf32, #tpu.memory_space<vmem>>, vector<8x256xf32>
      tpu.vector_store %arg8[%c0_17, %c0_18], %19 {strides = array<i32>} : memref<8x256xf32, #tpu.memory_space<vmem>>, vector<8x256xf32>,
    } else {
    }
    %c0 = arith.constant 0 : index
    %c0_1 = arith.constant 0 : index
    %3 = vector.load %arg2[%c0, %c0_1] : memref<8x256xf32, #tpu.memory_space<vmem>>, vector<8x256xf32>
    %c0_2 = arith.constant 0 : index
    %c0_3 = arith.constant 0 : index
    %4 = vector.load %arg3[%c0_2, %c0_3] : memref<256x256xf32, #tpu.memory_space<vmem>>, vector<256x256xf32>
    %cst = arith.constant dense<0.000000e+00> : vector<8x256xf32>
    %5 = tpu.matmul %3, %4, %cst {dimension_numbers = #tpu.dot_dimension_numbers<[1], [0], [0], [1], [0, 0, 1, 1], [], []>} : vector<8x256xf32>, vector<256x256xf32>, vector<8x256xf32> -> vector<8x256xf32>
    %c0_4 = arith.constant 0 : index
    %c0_5 = arith.constant 0 : index
    %6 = vector.load %arg4[%c0_4, %c0_5] : memref<1x256xf32, #tpu.memory_space<vmem>>, vector<1x256xf32>
    %7 = vector.broadcast %6 : vector<1x256xf32> to vector<8x256xf32>
    %8 = arith.addf %5, %7 : vector<8x256xf32>
    %cst_6 = arith.constant 0.000000e+00 : f32
    %9 = vector.broadcast %cst_6 : f32 to vector<8x256xf32>
    %10 = arith.maximumf %8, %9 : vector<8x256xf32>
    %c0_7 = arith.constant 0 : index
    %c0_8 = arith.constant 0 : index
    %11 = vector.load %arg8[%c0_7, %c0_8] : memref<8x256xf32, #tpu.memory_space<vmem>>, vector<8x256xf32>
    %c0_9 = arith.constant 0 : index
    %c0_10 = arith.constant 0 : index
    %12 = vector.load %arg5[%c0_9, %c0_10] : memref<256x256xf32, #tpu.memory_space<vmem>>, vector<256x256xf32>
    %cst_11 = arith.constant dense<0.000000e+00> : vector<8x256xf32>
    %13 = tpu.matmul %10, %12, %cst_11 {dimension_numbers = #tpu.dot_dimension_numbers<[1], [0], [0], [1], [0, 0, 1, 1], [], []>} : vector<8x256xf32>, vector<256x256xf32>, vector<8x256xf32> -> vector<8x256xf32>
    %14 = arith.addf %11, %13 : vector<8x256xf32>
    %c0_12 = arith.constant 0 : index
    %c0_13 = arith.constant 0 : index
    %15 = vector.load %arg8[%c0_12, %c0_13] : memref<8x256xf32, #tpu.memory_space<vmem>>, vector<8x256xf32>
    tpu.vector_store %arg8[%c0_12, %c0_13], %14 {strides = array<i32>} : memref<8x256xf32, #tpu.memory_space<vmem>>, vector<8x256xf32>,
    %c0_i32_14 = arith.constant 0 : i32
    %16 = arith.cmpi eq, %arg1, %c0_i32_14 : i32
    %17 = arith.extui %16 : i1 to i32
    %c0_i32_15 = arith.constant 0 : i32
    %18 = arith.cmpi ne, %17, %c0_i32_15 : i32
    scf.if %18 {
      %c0_16 = arith.constant 0 : index
      %c0_17 = arith.constant 0 : index
      %19 = vector.load %arg8[%c0_16, %c0_17] : memref<8x256xf32, #tpu.memory_space<vmem>>, vector<8x256xf32>
      %c0_18 = arith.constant 0 : index
      %c0_19 = arith.constant 0 : index
      %20 = vector.load %arg6[%c0_18, %c0_19] : memref<1x256xf32, #tpu.memory_space<vmem>>, vector<1x256xf32>
      %21 = vector.broadcast %20 : vector<1x256xf32> to vector<8x256xf32>
      %22 = arith.addf %19, %21 : vector<8x256xf32>
      %c0_20 = arith.constant 0 : index
      %c0_21 = arith.constant 0 : index
      %23 = vector.load %arg7[%c0_20, %c0_21] : memref<8x256xf32, #tpu.memory_space<vmem>>, vector<8x256xf32>
      tpu.vector_store %arg7[%c0_20, %c0_21], %22 {strides = array<i32>} : memref<8x256xf32, #tpu.memory_space<vmem>>, vector<8x256xf32>,
    } else {
    }
    return
  }
  func.func @transform_0(%arg0: i32, %arg1: i32) -> (i32, i32) {
    %c0_i32 = arith.constant 0 : i32
    %c0_i32_0 = arith.constant 0 : i32
    return %arg0, %c0_i32 : i32, i32
  }
  func.func @transform_1(%arg0: i32, %arg1: i32) -> (i32, i32) {
    %c0_i32 = arith.constant 0 : i32
    %c0_i32_0 = arith.constant 0 : i32
    return %c0_i32, %arg1 : i32, i32
  }
  func.func @transform_2(%arg0: i32, %arg1: i32) -> (i32, i32) {
    %c0_i32 = arith.constant 0 : i32
    %c0_i32_0 = arith.constant 0 : i32
    return %c0_i32, %arg1 : i32, i32
  }
  func.func @transform_3(%arg0: i32, %arg1: i32) -> (i32, i32) {
    %c0_i32 = arith.constant 0 : i32
    %c0_i32_0 = arith.constant 0 : i32
    return %arg1, %c0_i32 : i32, i32
  }
  func.func @transform_4(%arg0: i32, %arg1: i32) -> (i32, i32) {
    %c0_i32 = arith.constant 0 : i32
    %c0_i32_0 = arith.constant 0 : i32
    %c0_i32_1 = arith.constant 0 : i32
    return %c0_i32, %c0_i32_0 : i32, i32
  }
  func.func @transform_5(%arg0: i32, %arg1: i32) -> (i32, i32) {
    %c0_i32 = arith.constant 0 : i32
    %c0_i32_0 = arith.constant 0 : i32
    return %arg0, %c0_i32 : i32, i32
  }
}

</mosaic_0001>

<bundles_post_ra>
// kernel: _two_layer_net_impl.1
= control target key start
LH: loop header
LB: loop body
LE: loop exit
PB: predicated region body
PF: predicated region fallthrough
CT: control target
= control target key end

     0   :  { %10 = vsyncpa [#allocation4], 0  ;;  %s805_s0 = inlined_call_operand.hbm [shape: f32[8,256], index: 0, kind: input, shape index: {}]   ;;  %s806_s1 = inlined_call_operand.hbm [shape: f32[256,256], index: 1, kind: input, shape index: {}]   ;;  %s807_s2 = inlined_call_operand.hbm [shape: f32[1,256], index: 2, kind: input, shape index: {}]   ;;  %s808_s3 = inlined_call_operand.hbm [shape: f32[256,256], index: 3, kind: input, shape index: {}]   ;;  %s809_s4 = inlined_call_operand.hbm [shape: f32[1,256], index: 4, kind: input, shape index: {}]   ;;  %s810_s5 = inlined_call_operand.hbm [shape: f32[8,256], index: 5, kind: output, shape index: {}]  }
   0x1   :  { %11 = vsyncpa [#allocation7], 0 }
   0x2   :  { %12 = vsyncpa [#allocation10], 0 }
   0x3   :  { %13 = vsyncpa [#allocation5], 0  ;;  %s695_s18 = smov [#allocation6]   ;;  %s555_s22 = scalar_lea.hbm %s806_s1, 8192 }
   0x4   :  { %s29_s19 = sshll.u32 %s695_s18, 4  ;;  %p556_p0 = scmp.ne.s32.totalorder %s806_s1, %s555_s22  ;;  %s30_s19 = int_to_ptr.vmem [resolvable:$true] %s29_s19 }
   0x5   :  { %p559_p1 = scmp.lt.u32.totalorder %s555_s22, %s806_s1 }
   0x7   :  { %p561_p2 = pnand %p559_p1, %p556_p0 }
   0x9   :  { %564 = shalt.err (!%p561_p2)
}
   0xa   :  { %s565_s27 = scalar_lea.vmem %s30_s19, 8192  ;;  %p570_p4 = scmp.lt.s32.totalorder %s30_s19, %s30_s19 }
   0xb   :  { %p566_p3 = scmp.ne.s32.totalorder %s30_s19, %s565_s27  ;;  %p571_p5 = scmp.lt.s32.totalorder %s565_s27, %s565_s27 }
   0xd   :  { %p572_p6 = por %p571_p5, %p570_p4 }
   0xf   :  { %p573_p7 = pnand %p572_p6, %p566_p3 }
  0x11   :  { %576 = shalt.err (!%p573_p7)
}
  0x12   :  { %s696_s28 = smov 256   ;;  %s697_s29 = smov 16  }
  0x13   :  { %35 = dma.hbm_to_vmem [thread:$0]  %s806_s1, 8192, %s30_s19, [#allocation7], %s696_s28, %s696_s28, %s697_s29  }
  0x14   :  { %s698_s7 = smov [#allocation9]   ;;  %s699_s9 = smov [#allocation3]  }
  0x15   :  { %s51_s8 = sshll.u32 %s698_s7, 4  ;;  %s20_s10 = sshll.u32 %s699_s9, 4  ;;  %s52_s8 = int_to_ptr.vmem [resolvable:$true] %s51_s8  ;;  %s21_s10 = int_to_ptr.vmem [resolvable:$true] %s20_s10 }
  0x16   :  { %s577_s13 = scalar_lea.hbm %s808_s3, 8192 }
  0x17   :  { %p578_p8 = scmp.ne.s32.totalorder %s808_s3, %s577_s13  ;;  %p581_p9 = scmp.lt.u32.totalorder %s577_s13, %s808_s3 }
  0x19   :  { %p583_p10 = pnand %p581_p9, %p578_p8 }
  0x1b   :  { %586 = shalt.err (!%p583_p10)
}
  0x1c   :  { %s587_s1 = scalar_lea.vmem %s52_s8, 8192  ;;  %p592_p12 = scmp.lt.s32.totalorder %s52_s8, %s52_s8 }
  0x1d   :  { %p588_p11 = scmp.ne.s32.totalorder %s52_s8, %s587_s1  ;;  %p593_p13 = scmp.lt.s32.totalorder %s587_s1, %s587_s1 }
  0x1f   :  { %p594_p0 = por %p593_p13, %p592_p12 }
  0x21   :  { %p595_p1 = pnand %p594_p0, %p588_p11 }
  0x23   :  { %598 = shalt.err (!%p595_p1)
}
  0x24   :  { %57 = dma.hbm_to_vmem [thread:$0]  %s808_s3, 8192, %s52_s8, [#allocation10], %s696_s28, %s696_s28, %s697_s29  }
  0x25   :  { %s599_s22 = scalar_lea.hbm %s805_s0, 256 }
  0x26   :  { %p600_p2 = scmp.ne.s32.totalorder %s805_s0, %s599_s22  ;;  %p603_p3 = scmp.lt.u32.totalorder %s599_s22, %s805_s0 }
  0x28   :  { %p605_p4 = pnand %p603_p3, %p600_p2 }
  0x2a   :  { %608 = shalt.err (!%p605_p4)
}
  0x2b   :  { %s609_s27 = scalar_lea.vmem %s21_s10, 256  ;;  %p614_p6 = scmp.lt.s32.totalorder %s21_s10, %s21_s10 }
  0x2c   :  { %p610_p5 = scmp.ne.s32.totalorder %s21_s10, %s609_s27  ;;  %p615_p7 = scmp.lt.s32.totalorder %s609_s27, %s609_s27 }
  0x2e   :  { %p616_p8 = por %p615_p7, %p614_p6 }
  0x30   :  { %p617_p9 = pnand %p616_p8, %p610_p5 }
  0x32   :  { %620 = shalt.err (!%p617_p9)
}
  0x33   :  { %23 = dma.hbm_to_vmem [thread:$0]  %s805_s0, 256, %s21_s10, [#allocation4]  }
  0x34   :  { %s700_s29 = smov [#allocation8]   ;;  %s701_s6 = smov [#allocation11]  }
  0x35   :  { %s42_s30 = sshll.u32 %s700_s29, 4  ;;  %s64_s7 = sshll.u32 %s701_s6, 4  ;;  %s43_s30 = int_to_ptr.vmem [resolvable:$true] %s42_s30  ;;  %s65_s7 = int_to_ptr.vmem [resolvable:$true] %s64_s7 }
  0x36   :  { %s621_s11 = scalar_lea.hbm %s807_s2, 32 }
  0x37   :  { %p622_p10 = scmp.ne.s32.totalorder %s807_s2, %s621_s11  ;;  %p625_p11 = scmp.lt.u32.totalorder %s621_s11, %s807_s2 }
  0x39   :  { %p627_p12 = pnand %p625_p11, %p622_p10 }
  0x3b   :  { %630 = shalt.err (!%p627_p12)
}
  0x3c   :  { %s631_s0 = scalar_lea.vmem %s43_s30, 32  ;;  %p636_p0 = scmp.lt.s32.totalorder %s43_s30, %s43_s30 }
  0x3d   :  { %p632_p13 = scmp.ne.s32.totalorder %s43_s30, %s631_s0  ;;  %p637_p1 = scmp.lt.s32.totalorder %s631_s0, %s631_s0 }
  0x3f   :  { %p638_p2 = por %p637_p1, %p636_p0 }
  0x41   :  { %p639_p3 = pnand %p638_p2, %p632_p13 }
  0x43   :  { %642 = shalt.err (!%p639_p3)
}
  0x44   :  { %45 = dma.hbm_to_vmem [thread:$0]  %s807_s2, 32, %s43_s30, [#allocation7]  }
  0x45   :  { %s643_s18 = scalar_lea.hbm %s809_s4, 32 }
  0x46   :  { %p644_p4 = scmp.ne.s32.totalorder %s809_s4, %s643_s18  ;;  %p647_p5 = scmp.lt.u32.totalorder %s643_s18, %s809_s4 }
  0x48   :  { %p649_p6 = pnand %p647_p5, %p644_p4 }
  0x4a   :  { %652 = shalt.err (!%p649_p6)
}
  0x4b   :  { %s653_s23 = scalar_lea.vmem %s65_s7, 32  ;;  %p658_p8 = scmp.lt.s32.totalorder %s65_s7, %s65_s7 }
  0x4c   :  { %p654_p7 = scmp.ne.s32.totalorder %s65_s7, %s653_s23  ;;  %p659_p9 = scmp.lt.s32.totalorder %s653_s23, %s653_s23 }
  0x4e   :  { %p660_p10 = por %p659_p9, %p658_p8 }
  0x50   :  { %p661_p11 = pnand %p660_p10, %p654_p7 }
  0x52   :  { %664 = shalt.err (!%p661_p11)
}
  0x53   :  { %67 = dma.hbm_to_vmem [thread:$0]  %s809_s4, 32, %s65_s7, [#allocation10]  }
  0x54   :  { %687 = dma.done.wait [#allocation4], 256  }
  0x55   :  { %688 = vsyncadd [#allocation4], 4294967040 }
  0x56   :  { %689 = dma.done.wait [#allocation7], 8224  }
  0x57   :  { %690 = vsyncadd [#allocation7], 4294959072 }
  0x58   :  { %691 = dma.done.wait [#allocation10], 8224  }
  0x59   :  { %692 = vsyncadd [#allocation10], 4294959072  ;;  %v92_v0 = vld [vmem:[#allocation6 + $0x8] sm:$0xff]  ;;  %v94_v1 = vld [vmem:[#allocation6 + $0x18] sm:$0xff]  ;;  %s702_s4 = smov [#allocation12]  }
  0x5a   :  { %v91_v2 = vld [vmem:[#allocation6] sm:$0xff]  ;;  %v419_v3 = vpack.c.bf16 %v94_v1, %v92_v0  ;;  %v93_v4 = vld [vmem:[#allocation6 + $0x10] sm:$0xff]  ;;  %v96_v5 = vld [vmem:[#allocation6 + $0x28] sm:$0xff]  ;;  %s408_s25 = sshll.u32 %s702_s4, 4  ;;  %s409_s25 = int_to_ptr.vmem [resolvable:$true] %s408_s25 }
  0x5b   :  { %v98_v6 = vld [vmem:[#allocation6 + $0x38] sm:$0xff]  ;;  %v421_v7 = vpack.c.bf16 %v93_v4, %v91_v2  ;;  %v95_v9 = vld [vmem:[#allocation6 + $0x20] sm:$0xff]  ;;  %v97_v10 = vld [vmem:[#allocation6 + $0x30] sm:$0xff]  ;;  %s665_s26 = scalar_lea.vmem %s409_s25, 256  ;;  %p670_p13 = scmp.lt.s32.totalorder %s409_s25, %s409_s25 }
  0x5c   :  { %v423_v8 = vpack.c.bf16 %v98_v6, %v96_v5  ;;  %v100_v11 = vld [vmem:[#allocation6 + $0x48] sm:$0xff]  ;;  %420 = vmatprep.subr.bf16.mxu0 %v419_v3  ;;  %v102_v12 = vld [vmem:[#allocation6 + $0x58] sm:$0xff]  ;;  %v425_v13 = vpack.c.bf16 %v97_v10, %v95_v9  ;;  %v99_v15 = vld [vmem:[#allocation6 + $0x40] sm:$0xff]  ;;  %p666_p12 = scmp.ne.s32.totalorder %s409_s25, %s665_s26  ;;  %p671_p0 = scmp.lt.s32.totalorder %s665_s26, %s665_s26 }
  0x5d   :  { %422 = vmatpush1.bf16.msra.mxu0 %v421_v7  ;;  %v427_v14 = vpack.c.bf16 %v102_v12, %v100_v11  ;;  %v101_v16 = vld [vmem:[#allocation6 + $0x50] sm:$0xff]  ;;  %v104_v17 = vld [vmem:[#allocation6 + $0x68] sm:$0xff]  ;;  %v106_v18 = vld [vmem:[#allocation6 + $0x78] sm:$0xff] }
  0x5e   :  { %424 = vmatprep.subr.bf16.mxu0 %v423_v8  ;;  %v429_v19 = vpack.c.bf16 %v101_v16, %v99_v15  ;;  %v431_v20 = vpack.c.bf16 %v106_v18, %v104_v17  ;;  %v103_v21 = vld [vmem:[#allocation6 + $0x60] sm:$0xff]  ;;  %v105_v22 = vld [vmem:[#allocation6 + $0x70] sm:$0xff]  ;;  %v108_v23 = vld [vmem:[#allocation6 + $0x88] sm:$0xff]  ;;  %p672_p1 = por %p671_p0, %p670_p13 }
  0x5f   :  { %v110_v24 = vld [vmem:[#allocation6 + $0x98] sm:$0xff]  ;;  %v433_v25 = vpack.c.bf16 %v105_v22, %v103_v21  ;;  %v107_v27 = vld [vmem:[#allocation6 + $0x80] sm:$0xff]  ;;  %v109_v28 = vld [vmem:[#allocation6 + $0x90] sm:$0xff] }
  0x60   :  { %v435_v26 = vpack.c.bf16 %v110_v24, %v108_v23  ;;  %v112_v29 = vld [vmem:[#allocation6 + $0xa8] sm:$0xff]  ;;  %v114_v30 = vld [vmem:[#allocation6 + $0xb8] sm:$0xff]  ;;  %v437_v31 = vpack.c.bf16 %v109_v28, %v107_v27  ;;  %v111_v33 = vld [vmem:[#allocation6 + $0xa0] sm:$0xff]  ;;  %p673_p2 = pnand %p672_p1, %p666_p12 }
  0x61   :  { %426 = vmatpush1.bf16.msra.mxu0 %v425_v13  ;;  %v439_v32 = vpack.c.bf16 %v114_v30, %v112_v29  ;;  %v113_v34 = vld [vmem:[#allocation6 + $0xb0] sm:$0xff]  ;;  %v116_v35 = vld [vmem:[#allocation6 + $0xc8] sm:$0xff]  ;;  %v118_v36 = vld [vmem:[#allocation6 + $0xd8] sm:$0xff] }
  0x62   :  { %428 = vmatprep.subr.bf16.mxu0 %v427_v14  ;;  %v441_v37 = vpack.c.bf16 %v113_v34, %v111_v33  ;;  %v115_v38 = vld [vmem:[#allocation6 + $0xc0] sm:$0xff]  ;;  %v117_v39 = vld [vmem:[#allocation6 + $0xd0] sm:$0xff]  ;;  %v443_v40 = vpack.c.bf16 %v118_v36, %v116_v35  ;;  %v120_v41 = vld [vmem:[#allocation6 + $0xe8] sm:$0xff] }
  0x63   :  { %v122_v42 = vld [vmem:[#allocation6 + $0xf8] sm:$0xff]  ;;  %v243_v44 = vld [vmem:[#allocation9 + $0x8] sm:$0xff]  ;;  %v242_v46 = vld [vmem:[#allocation9] sm:$0xff]  ;;  %v445_v51 = vpack.c.bf16 %v117_v39, %v115_v38 }
  0x64   :  { %v90_v43 = vld [vmem:[#allocation3 + $0x8] sm:$0xff]  ;;  %v247_v49 = vld [vmem:[#allocation9 + $0x28] sm:$0xff]  ;;  %v246_v54 = vld [vmem:[#allocation9 + $0x20] sm:$0xff]  ;;  %v447_v57 = vpack.c.bf16 %v122_v42, %v120_v41 }
  0x65   :  { %430 = vmatpush1.bf16.msra.mxu0 %v429_v19  ;;  %231 = vmatprep.mubr.f32.mxu0 %v90_v43  ;;  %v245_v45 = vld [vmem:[#allocation9 + $0x18] sm:$0xff]  ;;  %v244_v48 = vld [vmem:[#allocation9 + $0x10] sm:$0xff]  ;;  %v251_v56 = vld [vmem:[#allocation9 + $0x48] sm:$0xff] }
  0x66   :  { %432 = vmatprep.subr.bf16.mxu0 %v431_v20  ;;  %v483_v47 = vpack.c.bf16 %v245_v45, %v243_v44  ;;  %v249_v50 = vld [vmem:[#allocation9 + $0x38] sm:$0xff]  ;;  %v485_v52 = vpack.c.bf16 %v244_v48, %v242_v46  ;;  %v248_v55 = vld [vmem:[#allocation9 + $0x30] sm:$0xff]  ;;  %v124_v61 = vld [vmem:[#allocation6 + $0x108] sm:$0xff] }
  0x67   :  { %v487_v53 = vpack.c.bf16 %v249_v50, %v247_v49  ;;  %v119_v58 = vld [vmem:[#allocation6 + $0xe0] sm:$0xff]  ;;  %v121_v59 = vld [vmem:[#allocation6 + $0xf0] sm:$0xff]  ;;  %v126_v62 = vld [vmem:[#allocation6 + $0x118] sm:$0xff]  ;;  %v489_v63 = vpack.c.bf16 %v248_v55, %v246_v54 }
  0x68   :  { %484 = vmatprep.subr.bf16.mxu1 %v483_v47  ;;  %v253_v60 = vld [vmem:[#allocation9 + $0x58] sm:$0xff]  ;;  %v250_v1 = vld [vmem:[#allocation9 + $0x40] sm:$0xff]  ;;  %v252_v2 = vld [vmem:[#allocation9 + $0x50] sm:$0xff]  ;;  %v449_v3 = vpack.c.bf16 %v121_v59, %v119_v58  ;;  %v451_v6 = vpack.c.bf16 %v126_v62, %v124_v61 }
  0x69   :  { %434 = vmatpush1.bf16.msra.mxu0 %v433_v25  ;;  %486 = vmatpush1.bf16.msra.mxu1 %v485_v52  ;;  %v491_v0 = vpack.c.bf16 %v253_v60, %v251_v56  ;;  %v255_v4 = vld [vmem:[#allocation9 + $0x68] sm:$0xff]  ;;  %v257_v5 = vld [vmem:[#allocation9 + $0x78] sm:$0xff]  ;;  %v493_v11 = vpack.c.bf16 %v252_v2, %v250_v1  ;;  %v254_v13 = vld [vmem:[#allocation9 + $0x60] sm:$0xff] }
  0x6a   :  { %436 = vmatprep.subr.bf16.mxu0 %v435_v26  ;;  %488 = vmatprep.subr.bf16.mxu1 %v487_v53  ;;  %v123_v7 = vld [vmem:[#allocation6 + $0x100] sm:$0xff]  ;;  %v125_v8 = vld [vmem:[#allocation6 + $0x110] sm:$0xff]  ;;  %v128_v9 = vld [vmem:[#allocation6 + $0x128] sm:$0xff]  ;;  %v495_v12 = vpack.c.bf16 %v257_v5, %v255_v4 }
  0x6b   :  { %v130_v10 = vld [vmem:[#allocation6 + $0x138] sm:$0xff]  ;;  %v453_v15 = vpack.c.bf16 %v125_v8, %v123_v7  ;;  %v259_v16 = vld [vmem:[#allocation9 + $0x88] sm:$0xff]  ;;  %v127_v19 = vld [vmem:[#allocation6 + $0x120] sm:$0xff] }
  0x6c   :  { %v256_v14 = vld [vmem:[#allocation9 + $0x70] sm:$0xff]  ;;  %v261_v17 = vld [vmem:[#allocation9 + $0x98] sm:$0xff]  ;;  %v455_v18 = vpack.c.bf16 %v130_v10, %v128_v9  ;;  %v132_v21 = vld [vmem:[#allocation6 + $0x148] sm:$0xff] }
  0x6d   :  { %438 = vmatpush1.bf16.msra.mxu0 %v437_v31  ;;  %490 = vmatpush1.bf16.msra.mxu1 %v489_v63  ;;  %v129_v20 = vld [vmem:[#allocation6 + $0x130] sm:$0xff]  ;;  %v134_v22 = vld [vmem:[#allocation6 + $0x158] sm:$0xff]  ;;  %v497_v23 = vpack.c.bf16 %v256_v14, %v254_v13  ;;  %v499_v24 = vpack.c.bf16 %v261_v17, %v259_v16  ;;  %v258_v25 = vld [vmem:[#allocation9 + $0x80] sm:$0xff] }
  0x6e   :  { %440 = vmatprep.subr.bf16.mxu0 %v439_v32  ;;  %492 = vmatprep.subr.bf16.mxu1 %v491_v0  ;;  %v260_v26 = vld [vmem:[#allocation9 + $0x90] sm:$0xff]  ;;  %v457_v27 = vpack.c.bf16 %v129_v20, %v127_v19  ;;  %v263_v28 = vld [vmem:[#allocation9 + $0xa8] sm:$0xff]  ;;  %v265_v29 = vld [vmem:[#allocation9 + $0xb8] sm:$0xff]  ;;  %v459_v30 = vpack.c.bf16 %v134_v22, %v132_v21 }
  0x6f   :  { %v131_v31 = vld [vmem:[#allocation6 + $0x140] sm:$0xff]  ;;  %v133_v32 = vld [vmem:[#allocation6 + $0x150] sm:$0xff]  ;;  %v136_v33 = vld [vmem:[#allocation6 + $0x168] sm:$0xff]  ;;  %v501_v35 = vpack.c.bf16 %v260_v26, %v258_v25  ;;  %v503_v36 = vpack.c.bf16 %v265_v29, %v263_v28 }
  0x70   :  { %v138_v34 = vld [vmem:[#allocation6 + $0x178] sm:$0xff]  ;;  %v461_v39 = vpack.c.bf16 %v133_v32, %v131_v31  ;;  %v135_v43 = vld [vmem:[#allocation6 + $0x160] sm:$0xff]  ;;  %v137_v44 = vld [vmem:[#allocation6 + $0x170] sm:$0xff] }
  0x71   :  { %442 = vmatpush1.bf16.msra.mxu0 %v441_v37  ;;  %494 = vmatpush1.bf16.msra.mxu1 %v493_v11  ;;  %v262_v37 = vld [vmem:[#allocation9 + $0xa0] sm:$0xff]  ;;  %v264_v38 = vld [vmem:[#allocation9 + $0xb0] sm:$0xff]  ;;  %v269_v41 = vld [vmem:[#allocation9 + $0xd8] sm:$0xff]  ;;  %v463_v42 = vpack.c.bf16 %v138_v34, %v136_v33 }
  0x72   :  { %444 = vmatprep.subr.bf16.mxu0 %v443_v40  ;;  %496 = vmatprep.subr.bf16.mxu1 %v495_v12  ;;  %v267_v40 = vld [vmem:[#allocation9 + $0xc8] sm:$0xff]  ;;  %v142_v46 = vld [vmem:[#allocation6 + $0x198] sm:$0xff]  ;;  %v505_v47 = vpack.c.bf16 %v264_v38, %v262_v37  ;;  %v266_v49 = vld [vmem:[#allocation9 + $0xc0] sm:$0xff] }
  0x73   :  { %v140_v45 = vld [vmem:[#allocation6 + $0x188] sm:$0xff]  ;;  %v507_v48 = vpack.c.bf16 %v269_v41, %v267_v40  ;;  %v268_v50 = vld [vmem:[#allocation9 + $0xd0] sm:$0xff]  ;;  %v273_v53 = vld [vmem:[#allocation9 + $0xf8] sm:$0xff] }
  0x74   :  { %v271_v52 = vld [vmem:[#allocation9 + $0xe8] sm:$0xff]  ;;  %v467_v54 = vpack.c.bf16 %v142_v46, %v140_v45  ;;  %v139_v55 = vld [vmem:[#allocation6 + $0x180] sm:$0xff]  ;;  %v146_v58 = vld [vmem:[#allocation6 + $0x1b8] sm:$0xff]  ;;  %v509_v59 = vpack.c.bf16 %v268_v50, %v266_v49 }
  0x75   :  { %446 = vmatpush1.bf16.msra.mxu0 %v445_v51  ;;  %498 = vmatpush1.bf16.msra.mxu1 %v497_v23  ;;  %v465_v51 = vpack.c.bf16 %v137_v44, %v135_v43  ;;  %v141_v56 = vld [vmem:[#allocation6 + $0x190] sm:$0xff]  ;;  %v511_v60 = vpack.c.bf16 %v273_v53, %v271_v52  ;;  %v270_v61 = vld [vmem:[#allocation9 + $0xe0] sm:$0xff]  ;;  %v277_v1 = vld [vmem:[#allocation9 + $0x118] sm:$0xff] }
  0x76   :  { %448 = vmatprep.subr.bf16.mxu0 %v447_v57  ;;  %500 = vmatprep.subr.bf16.mxu1 %v499_v24  ;;  %v144_v57 = vld [vmem:[#allocation6 + $0x1a8] sm:$0xff]  ;;  %v272_v62 = vld [vmem:[#allocation9 + $0xf0] sm:$0xff]  ;;  %v469_v63 = vpack.c.bf16 %v141_v56, %v139_v55  ;;  %v281_v13 = vld [vmem:[#allocation9 + $0x138] sm:$0xff] }
  0x77   :  { %v275_v0 = vld [vmem:[#allocation9 + $0x108] sm:$0xff]  ;;  %v471_v2 = vpack.c.bf16 %v146_v58, %v144_v57  ;;  %v513_v7 = vpack.c.bf16 %v272_v62, %v270_v61  ;;  %v274_v9 = vld [vmem:[#allocation9 + $0x100] sm:$0xff]  ;;  %v276_v10 = vld [vmem:[#allocation9 + $0x110] sm:$0xff] }
  0x78   :  { %v145_v4 = vld [vmem:[#allocation6 + $0x1b0] sm:$0xff]  ;;  %v148_v5 = vld [vmem:[#allocation6 + $0x1c8] sm:$0xff]  ;;  %v515_v8 = vpack.c.bf16 %v277_v1, %v275_v0  ;;  %v517_v19 = vpack.c.bf16 %v276_v10, %v274_v9  ;;  %v285_v25 = vld [vmem:[#allocation9 + $0x158] sm:$0xff] }
  0x79   :  { %450 = vmatpush1.bf16.msra.mxu0 %v449_v3  ;;  %502 = vmatpush1.bf16.msra.mxu1 %v501_v35  ;;  %v143_v3 = vld [vmem:[#allocation6 + $0x1a0] sm:$0xff]  ;;  %v279_v12 = vld [vmem:[#allocation9 + $0x128] sm:$0xff]  ;;  %v280_v22 = vld [vmem:[#allocation9 + $0x130] sm:$0xff] }
  0x7a   :  { %452 = vmatprep.subr.bf16.mxu0 %v451_v6  ;;  %504 = vmatprep.subr.bf16.mxu1 %v503_v36  ;;  %v150_v6 = vld [vmem:[#allocation6 + $0x1d8] sm:$0xff]  ;;  %v473_v11 = vpack.c.bf16 %v145_v4, %v143_v3  ;;  %v149_v16 = vld [vmem:[#allocation6 + $0x1d0] sm:$0xff]  ;;  %v152_v17 = vld [vmem:[#allocation6 + $0x1e8] sm:$0xff]  ;;  %v519_v20 = vpack.c.bf16 %v281_v13, %v279_v12 }
  0x7b   :  { %v475_v14 = vpack.c.bf16 %v150_v6, %v148_v5  ;;  %v278_v21 = vld [vmem:[#allocation9 + $0x120] sm:$0xff]  ;;  %v283_v24 = vld [vmem:[#allocation9 + $0x148] sm:$0xff]  ;;  %v284_v32 = vld [vmem:[#allocation9 + $0x150] sm:$0xff] }
  0x7c   :  { %v153_v28 = vld [vmem:[#allocation6 + $0x1f0] sm:$0xff]  ;;  %v521_v29 = vpack.c.bf16 %v280_v22, %v278_v21  ;;  %v282_v31 = vld [vmem:[#allocation9 + $0x140] sm:$0xff]  ;;  %v289_v35 = vld [vmem:[#allocation9 + $0x178] sm:$0xff] }
  0x7d   :  { %454 = vmatpush1.bf16.msra.mxu0 %v453_v15  ;;  %506 = vmatpush1.bf16.msra.mxu1 %v505_v47  ;;  %v147_v15 = vld [vmem:[#allocation6 + $0x1c0] sm:$0xff]  ;;  %v287_v34 = vld [vmem:[#allocation9 + $0x168] sm:$0xff]  ;;  %v525_v36 = vpack.c.bf16 %v284_v32, %v282_v31  ;;  %v292_v46 = vld [vmem:[#allocation9 + $0x190] sm:$0xff] }
  0x7e   :  { %456 = vmatprep.subr.bf16.mxu0 %v455_v18  ;;  %508 = vmatprep.subr.bf16.mxu1 %v507_v48  ;;  %v154_v18 = vld [vmem:[#allocation6 + $0x1f8] sm:$0xff]  ;;  %v477_v23 = vpack.c.bf16 %v149_v16, %v147_v15  ;;  %v527_v37 = vpack.c.bf16 %v289_v35, %v287_v34  ;;  %v286_v38 = vld [vmem:[#allocation9 + $0x160] sm:$0xff]  ;;  %v89_v40 = vld [vmem:[#allocation3] sm:$0xff] }
  0x7f   :  { %v479_v26 = vpack.c.bf16 %v154_v18, %v152_v17  ;;  %v291_v41 = vld [vmem:[#allocation9 + $0x188] sm:$0xff]  ;;  %v290_v45 = vld [vmem:[#allocation9 + $0x180] sm:$0xff]  ;;  %v297_v48 = vld [vmem:[#allocation9 + $0x1b8] sm:$0xff] }
  0x80   :  { %v295_v47 = vld [vmem:[#allocation9 + $0x1a8] sm:$0xff]  ;;  %v533_v49 = vpack.c.bf16 %v292_v46, %v290_v45  ;;  %v296_v52 = vld [vmem:[#allocation9 + $0x1b0] sm:$0xff]  ;;  %v298_v57 = vld [vmem:[#allocation9 + $0x1c0] sm:$0xff] }
  0x81   :  { %458 = vmatpush1.bf16.msra.mxu0 %v457_v27  ;;  %510 = vmatpush1.bf16.msra.mxu1 %v509_v59  ;;  %v151_v27 = vld [vmem:[#allocation6 + $0x1e0] sm:$0xff]  ;;  %v535_v50 = vpack.c.bf16 %v297_v48, %v295_v47  ;;  %v299_v53 = vld [vmem:[#allocation9 + $0x1c8] sm:$0xff]  ;;  %v300_v58 = vld [vmem:[#allocation9 + $0x1d0] sm:$0xff] }
  0x82   :  { %460 = vmatprep.subr.bf16.mxu0 %v459_v30  ;;  %512 = vmatprep.subr.bf16.mxu1 %v511_v60  ;;  %v523_v30 = vpack.c.bf16 %v285_v25, %v283_v24  ;;  %v481_v33 = vpack.c.bf16 %v153_v28, %v151_v27  ;;  %v541_v59 = vpack.c.bf16 %v300_v58, %v298_v57  ;;  %v303_v60 = vld [vmem:[#allocation9 + $0x1e8] sm:$0xff]  ;;  %v305_v61 = vld [vmem:[#allocation9 + $0x1f8] sm:$0xff]  ;;  %v304_v0 = vld [vmem:[#allocation9 + $0x1f0] sm:$0xff] }
  0x83   :  { %v543_v62 = vpack.c.bf16 %v305_v61, %v303_v60  ;;  %v155_v5 = vld [vmem:[#allocation8] sm:$0x3]  ;;  %v386_v15 = vld [vmem:[#allocation11] sm:$0x3] }
  0x85   :  { %462 = vmatpush1.bf16.msra.mxu0 %v461_v39  ;;  %514 = vmatpush1.bf16.msra.mxu1 %v513_v7  ;;  %v288_v39 = vld [vmem:[#allocation9 + $0x170] sm:$0xff] }
  0x86   :  { %464 = vmatprep.subr.bf16.mxu0 %v463_v42  ;;  %516 = vmatprep.subr.bf16.mxu1 %v515_v8  ;;  %v293_v42 = vld [vmem:[#allocation9 + $0x198] sm:$0xff]  ;;  %v529_v43 = vpack.c.bf16 %v288_v39, %v286_v38 }
  0x87   :  { %v531_v44 = vpack.c.bf16 %v293_v42, %v291_v41 }
  0x89   :  { %466 = vmatpush1.bf16.msra.mxu0 %v465_v51  ;;  %518 = vmatpush1.bf16.msra.mxu1 %v517_v19  ;;  %v294_v51 = vld [vmem:[#allocation9 + $0x1a0] sm:$0xff] }
  0x8a   :  { %468 = vmatprep.subr.bf16.mxu0 %v467_v54  ;;  %520 = vmatprep.subr.bf16.mxu1 %v519_v20  ;;  %v301_v54 = vld [vmem:[#allocation9 + $0x1d8] sm:$0xff]  ;;  %v537_v55 = vpack.c.bf16 %v296_v52, %v294_v51 }
  0x8b   :  { %v539_v56 = vpack.c.bf16 %v301_v54, %v299_v53 }
  0x8d   :  { %470 = vmatpush1.bf16.msra.mxu0 %v469_v63  ;;  %522 = vmatpush1.bf16.msra.mxu1 %v521_v29  ;;  %v302_v63 = vld [vmem:[#allocation9 + $0x1e0] sm:$0xff] }
  0x8e   :  { %472 = vmatprep.subr.bf16.mxu0 %v471_v2  ;;  %524 = vmatprep.subr.bf16.mxu1 %v523_v30  ;;  %v545_v1 = vpack.c.bf16 %v304_v0, %v302_v63  ;;  %v157_v2 = vlaneseq }
  0x90   :  { %v158_v3 = vshrl.u32 %v157_v2, 7 }
  0x91   :  { %474 = vmatpush1.bf16.msra.mxu0 %v473_v11  ;;  %526 = vmatpush1.bf16.msra.mxu1 %v525_v36 }
  0x92   :  { %476 = vmatprep.subr.bf16.mxu0 %v475_v14  ;;  %528 = vmatprep.subr.bf16.mxu1 %v527_v37  ;;  %v159_v4 = vsub.s32 0, %v158_v3  ;;  %v163_v6 = vsub.s32 1, %v158_v3 }
  0x94   :  { %v160_v7 = vrot.slane %v155_v5, %v159_v4  ;;  %v164_v8 = vrot.slane %v155_v5, %v163_v6  ;;  %v391_v16 = vrot.slane %v386_v15, %v159_v4  ;;  %v395_v17 = vrot.slane %v386_v15, %v163_v6 }
  0x95   :  { %478 = vmatpush1.bf16.msra.mxu0 %v477_v23  ;;  %530 = vmatpush1.bf16.msra.mxu1 %v529_v43 }
  0x96   :  { %480 = vmatprep.subr.bf16.mxu0 %v479_v26  ;;  %532 = vmatprep.subr.bf16.mxu1 %v531_v44 }
  0x99   :  { %482 = vmatpush1.bf16.msra.mxu0 %v481_v33  ;;  %534 = vmatpush1.bf16.msra.mxu1 %v533_v49 }
  0x9a   :  { %536 = vmatprep.subr.bf16.mxu1 %v535_v50 }
  0x9c   :  { %232 = vmatmul.mubr.f32.vlgmr.msra.gmra.mrb[0].mxu0 %v89_v40 }
  0x9d   :  { %538 = vmatpush1.bf16.msra.mxu1 %v537_v55 }
  0x9e   :  { %540 = vmatprep.subr.bf16.mxu1 %v539_v56 }
  0xa1   :  { %542 = vmatpush1.bf16.msra.mxu1 %v541_v59 }
  0xa2   :  { %544 = vmatprep.subr.bf16.mxu1 %v543_v62 }
  0xa5   :  { %546 = vmatpush1.bf16.msra.mxu1 %v545_v1 }
 0x16f   :  { %v233_v9 = vpop.f32.mrb[0].mxu0 }
 0x170   :  { %v234_v10 = vadd.f32 %v233_v9, %v160_v7  ;;  %v235_v11 = vpop.f32.mrb[1].mxu0 }
 0x171   :  { %v236_v12 = vadd.f32 %v235_v11, %v164_v8 }
 0x172   :  { %v238_v14 = vmax.f32 %v234_v10, 0.0 }
 0x173   :  { %v239_v13 = vmax.f32 %v236_v12, 0.0 }
 0x175   :  { %370 = vmatprep.mubr.f32.mxu1 %v239_v13 }
 0x176   :  { %371 = vmatmul.mubr.f32.vlgmr.msra.gmra.mrb[0].mxu1 %v238_v14 }
 0x249   :  { %v372_v18 = vpop.f32.mrb[0].mxu1 }
 0x24a   :  { %v398_v19 = vadd.f32 %v391_v16, %v372_v18  ;;  %v374_v20 = vpop.f32.mrb[1].mxu1 }
 0x24b   :  { %v399_v21 = vadd.f32 %v395_v17, %v374_v20 }
 0x24c   :  { %400 = vst [vmem:[#allocation12] sm:$0xff] %v398_v19 }
 0x24d   :  { %401 = vst [vmem:[#allocation12 + $0x8] sm:$0xff] %v399_v21 }
 0x24e   :  { %676 = shalt.err (!%p673_p2)
}
 0x24f   :  { %s677_s28 = scalar_lea.hbm %s810_s5, 256 }
 0x250   :  { %p678_p3 = scmp.ne.s32.totalorder %s810_s5, %s677_s28  ;;  %p681_p4 = scmp.lt.u32.totalorder %s677_s28, %s810_s5 }
 0x252   :  { %p683_p5 = pnand %p681_p4, %p678_p3 }
 0x254   :  { %686 = shalt.err (!%p683_p5)
}
 0x255   :  { %411 = dma.vmem_to_hbm [thread:$0]  %s409_s25, 256, %s810_s5, [#allocation5]  }
 0x256   :  { %693 = dma.done.wait [#allocation5], 256  }
 0x257   :  { %694 = vsyncadd [#allocation5], 4294967040 }
 0x258   :  { %415 = vsyncpa [#allocation4], 1 }
 0x259   :  { %416 = vsyncpa [#allocation7], 1 }
 0x25a   :  { %417 = vsyncpa [#allocation10], 1 }
 0x25b   :  { %418 = vsyncpa [#allocation5], 1 }

</bundles_post_ra>
